<compile_context>
chip_gen: v6e
topology: v6e:2x2x1
jax: 0.10.0
libtpu: 0.0.40
codegen_flags: <defaults>
</compile_context>

<pallas_src>
import jax
import jax.numpy as jnp
from jax.experimental import pallas as pl
from jax.experimental.pallas import tpu as pltpu


def mlp_kernel(xt_ref, w1_ref, b1_ref, w2t_ref, b2_ref, ot_ref):
    xt = xt_ref[...]            # (K, TB)  f32, batch on lanes
    w1 = w1_ref[...]            # (H, K)   PyTorch-native (out, in)
    b1 = b1_ref[...]            # (H, 1)
    w2t = w2t_ref[...]          # (H, O)   layer-2 weight, (in, out)
    b2 = b2_ref[...]            # (O, 1)

    k_in = xt.shape[0]          # 5
    n_out = w2t.shape[1]        # 2

    # ---- layer 1: hT = W1 @ xT + b1 as K=5 column-broadcast FMAs (VPU) -----
    # w1[:, k:k+1] is a (H,1) lane-broadcast, xt[k:k+1,:] a (1,TB) sublane
    # broadcast; both are cheap relative to the (H, TB) multiply-adds.
    h = b1 + w1[:, 0:1] * xt[0:1, :]
    for k in range(1, k_in):    # unrolled, 5 terms
        h = h + w1[:, k:k + 1] * xt[k:k + 1, :]

    # ---- sigmoid on the EUP: sigmoid(h) = 0.5 * tanh(0.5 * h) + 0.5 --------
    s = 0.5 * jnp.tanh(0.5 * h) + 0.5          # (H, TB), exact in f32

    # ---- layer 2: yT = W2 @ sT + b2 as multiply + cross-sublane reduce -----
    # 2 lane-dense multiply passes over (H, TB) + 2 XLU reductions instead of
    # 20 read-modify-write passes over a padded slab.
    for o in range(n_out):      # unrolled, 2 outputs
        y_row = jnp.sum(s * w2t[:, o:o + 1], axis=0, keepdims=True)  # (1, TB)
        ot_ref[o:o + 1, :] = (y_row + b2[o:o + 1, :]).astype(ot_ref.dtype)


def network_forward(x, w1, b1, w2, b2, *, batch_tile=8192):
    """x: (B, 5); w1: (20, 5); b1: (20,); w2: (2, 20); b2: (2,) -> (B, 2)."""
    B, K = x.shape
    H = w1.shape[0]
    O = w2.shape[0]
    out_dtype = x.dtype

    # Layout plumbing in the wrapper: batch -> lanes, weights in the shapes
    # the kernel consumes directly (no in-kernel transposes).
    xT = x.T                      # (K, B)
    b1c = b1.reshape(H, 1)        # (H, 1)
    w2t = w2.T                    # (H, O)
    b2c = b2.reshape(O, 1)        # (O, 1)

    if B <= batch_tile:
        # Small batch: single un-gridded invocation, everything in VMEM.
        yT = pl.pallas_call(
            mlp_kernel,
            out_shape=jax.ShapeDtypeStruct((O, B), out_dtype),
            in_specs=[pl.BlockSpec(memory_space=pltpu.MemorySpace.VMEM)] * 5,
            out_specs=pl.BlockSpec(memory_space=pltpu.MemorySpace.VMEM),
        )(xT, w1, b1c, w2t, b2c)
        return yT.T

    # Large batch: tile the lane (batch) axis. Weights/biases map to block
    # (0, 0) every step so they stay resident in VMEM across the whole grid.
    TB = batch_tile
    nb = pl.cdiv(B, TB)
    Bp = nb * TB
    if Bp != B:
        # TODO(synk): drop the pad by relying on masked tail-block stores once
        # confirmed on the target Pallas version, or handle the tail with a
        # second small un-gridded call.
        xT = jnp.pad(xT, ((0, 0), (0, Bp - B)))

    yT = pl.pallas_call(
        mlp_kernel,
        out_shape=jax.ShapeDtypeStruct((O, Bp), out_dtype),
        grid=(nb,),
        in_specs=[
            pl.BlockSpec((K, TB), lambda i: (0, i)),   # xT: stream lane tiles
            pl.BlockSpec((H, K), lambda i: (0, 0)),    # W1: resident
            pl.BlockSpec((H, 1), lambda i: (0, 0)),    # b1: resident
            pl.BlockSpec((H, O), lambda i: (0, 0)),    # W2^T: resident
            pl.BlockSpec((O, 1), lambda i: (0, 0)),    # b2: resident
        ],
        out_specs=pl.BlockSpec((O, TB), lambda i: (0, i)),
        compiler_params=pltpu.CompilerParams(
            dimension_semantics=("parallel",)),
    )(xT, w1, b1c, w2t, b2c)
    return yT[:, :B].T


def init_params(key):
    # Mimic the PyTorch module: kaiming_normal_ on (out, in) weights
    # (std = sqrt(2 / fan_in)), biases zeroed.  Kept in PyTorch layout.
    k1, k2 = jax.random.split(key)
    w1 = jax.random.normal(k1, (20, 5), jnp.float32) * jnp.sqrt(2.0 / 5.0)
    b1 = jnp.zeros((20,), jnp.float32)
    w2 = jax.random.normal(k2, (2, 20), jnp.float32) * jnp.sqrt(2.0 / 20.0)
    b2 = jnp.zeros((2,), jnp.float32)
    return w1, b1, w2, b2


def _reference(x, w1, b1, w2, b2):
    return jax.nn.sigmoid(x @ w1.T + b1) @ w2.T + b2


if __name__ == "__main__":
    key = jax.random.PRNGKey(0)
    kx, kx2, kp = jax.random.split(key, 3)
    w1, b1, w2, b2 = init_params(kp)

    # --- small-batch path (un-gridded, whole arrays in VMEM) ---
    B = 8
    x = jax.random.normal(kx, (B, 5), jnp.float32)
    out = jax.block_until_ready(network_forward(x, w1, b1, w2, b2))
    ref = _reference(x, w1, b1, w2, b2)
    assert out.shape == (B, 2)
    assert jnp.allclose(out, ref, atol=1e-3, rtol=1e-3)

    # --- gridded batch-on-lanes path (ragged batch, padded to tile multiple) ---
    B2 = 300
    x2 = jax.random.normal(kx2, (B2, 5), jnp.float32)
    out2 = jax.block_until_ready(
        network_forward(x2, w1, b1, w2, b2, batch_tile=128))
    ref2 = _reference(x2, w1, b1, w2, b2)
    assert out2.shape == (B2, 2)
    assert jnp.allclose(out2, ref2, atol=1e-3, rtol=1e-3)

    print("KERNEL_OK")
</pallas_src>

<mosaic_0001>
module attributes {stable_mosaic.version = 11 : i64} {
  func.func @mlp_kernel(%arg0: memref<5x8xf32, #tpu.memory_space<vmem>>, %arg1: memref<20x5xf32, #tpu.memory_space<vmem>>, %arg2: memref<20x1xf32, #tpu.memory_space<vmem>>, %arg3: memref<20x2xf32, #tpu.memory_space<vmem>>, %arg4: memref<2x1xf32, #tpu.memory_space<vmem>>, %arg5: memref<2x8xf32, #tpu.memory_space<vmem>>) attributes {dimension_semantics = [], scalar_prefetch = 0 : i64, scratch_operands = 0 : i64, tpu.core_type = #tpu.core_type<tc>} {
    %c0 = arith.constant 0 : index
    %c0_0 = arith.constant 0 : index
    %0 = vector.load %arg0[%c0, %c0_0] : memref<5x8xf32, #tpu.memory_space<vmem>>, vector<5x8xf32>
    %c0_1 = arith.constant 0 : index
    %c0_2 = arith.constant 0 : index
    %1 = vector.load %arg1[%c0_1, %c0_2] : memref<20x5xf32, #tpu.memory_space<vmem>>, vector<20x5xf32>
    %c0_3 = arith.constant 0 : index
    %c0_4 = arith.constant 0 : index
    %2 = vector.load %arg2[%c0_3, %c0_4] : memref<20x1xf32, #tpu.memory_space<vmem>>, vector<20x1xf32>
    %c0_5 = arith.constant 0 : index
    %c0_6 = arith.constant 0 : index
    %3 = vector.load %arg3[%c0_5, %c0_6] : memref<20x2xf32, #tpu.memory_space<vmem>>, vector<20x2xf32>
    %c0_7 = arith.constant 0 : index
    %c0_8 = arith.constant 0 : index
    %4 = vector.load %arg4[%c0_7, %c0_8] : memref<2x1xf32, #tpu.memory_space<vmem>>, vector<2x1xf32>
    %5 = vector.extract_strided_slice %1 {offsets = [0, 0], sizes = [20, 1], strides = [1, 1]} : vector<20x5xf32> to vector<20x1xf32>
    %6 = vector.extract_strided_slice %0 {offsets = [0, 0], sizes = [1, 8], strides = [1, 1]} : vector<5x8xf32> to vector<1x8xf32>
    %7 = vector.broadcast %5 : vector<20x1xf32> to vector<20x8xf32>
    %8 = vector.broadcast %6 : vector<1x8xf32> to vector<20x8xf32>
    %9 = arith.mulf %7, %8 : vector<20x8xf32>
    %10 = vector.broadcast %2 : vector<20x1xf32> to vector<20x8xf32>
    %11 = arith.addf %10, %9 : vector<20x8xf32>
    %12 = vector.extract_strided_slice %1 {offsets = [0, 1], sizes = [20, 1], strides = [1, 1]} : vector<20x5xf32> to vector<20x1xf32>
    %13 = vector.extract_strided_slice %0 {offsets = [1, 0], sizes = [1, 8], strides = [1, 1]} : vector<5x8xf32> to vector<1x8xf32>
    %14 = vector.broadcast %12 : vector<20x1xf32> to vector<20x8xf32>
    %15 = vector.broadcast %13 : vector<1x8xf32> to vector<20x8xf32>
    %16 = arith.mulf %14, %15 : vector<20x8xf32>
    %17 = arith.addf %11, %16 : vector<20x8xf32>
    %18 = vector.extract_strided_slice %1 {offsets = [0, 2], sizes = [20, 1], strides = [1, 1]} : vector<20x5xf32> to vector<20x1xf32>
    %19 = vector.extract_strided_slice %0 {offsets = [2, 0], sizes = [1, 8], strides = [1, 1]} : vector<5x8xf32> to vector<1x8xf32>
    %20 = vector.broadcast %18 : vector<20x1xf32> to vector<20x8xf32>
    %21 = vector.broadcast %19 : vector<1x8xf32> to vector<20x8xf32>
    %22 = arith.mulf %20, %21 : vector<20x8xf32>
    %23 = arith.addf %17, %22 : vector<20x8xf32>
    %24 = vector.extract_strided_slice %1 {offsets = [0, 3], sizes = [20, 1], strides = [1, 1]} : vector<20x5xf32> to vector<20x1xf32>
    %25 = vector.extract_strided_slice %0 {offsets = [3, 0], sizes = [1, 8], strides = [1, 1]} : vector<5x8xf32> to vector<1x8xf32>
    %26 = vector.broadcast %24 : vector<20x1xf32> to vector<20x8xf32>
    %27 = vector.broadcast %25 : vector<1x8xf32> to vector<20x8xf32>
    %28 = arith.mulf %26, %27 : vector<20x8xf32>
    %29 = arith.addf %23, %28 : vector<20x8xf32>
    %30 = vector.extract_strided_slice %1 {offsets = [0, 4], sizes = [20, 1], strides = [1, 1]} : vector<20x5xf32> to vector<20x1xf32>
    %31 = vector.extract_strided_slice %0 {offsets = [4, 0], sizes = [1, 8], strides = [1, 1]} : vector<5x8xf32> to vector<1x8xf32>
    %32 = vector.broadcast %30 : vector<20x1xf32> to vector<20x8xf32>
    %33 = vector.broadcast %31 : vector<1x8xf32> to vector<20x8xf32>
    %34 = arith.mulf %32, %33 : vector<20x8xf32>
    %35 = arith.addf %29, %34 : vector<20x8xf32>
    %cst = arith.constant 5.000000e-01 : f32
    %36 = vector.broadcast %cst : f32 to vector<20x8xf32>
    %37 = arith.mulf %36, %35 : vector<20x8xf32>
    %38 = math.tanh %37 : vector<20x8xf32>
    %cst_9 = arith.constant 5.000000e-01 : f32
    %39 = vector.broadcast %cst_9 : f32 to vector<20x8xf32>
    %40 = arith.mulf %39, %38 : vector<20x8xf32>
    %cst_10 = arith.constant 5.000000e-01 : f32
    %41 = vector.broadcast %cst_10 : f32 to vector<20x8xf32>
    %42 = arith.addf %40, %41 : vector<20x8xf32>
    %43 = vector.extract_strided_slice %3 {offsets = [0, 0], sizes = [20, 1], strides = [1, 1]} : vector<20x2xf32> to vector<20x1xf32>
    %44 = vector.broadcast %43 : vector<20x1xf32> to vector<20x8xf32>
    %45 = arith.mulf %42, %44 : vector<20x8xf32>
    %cst_11 = arith.constant dense<0.000000e+00> : vector<8xf32>
    %46 = vector.multi_reduction <add>, %45, %cst_11 [0] : vector<20x8xf32> to vector<8xf32>
    %47 = vector.shape_cast %46 : vector<8xf32> to vector<1x8xf32>
    %48 = vector.extract_strided_slice %4 {offsets = [0, 0], sizes = [1, 1], strides = [1, 1]} : vector<2x1xf32> to vector<1x1xf32>
    %49 = vector.broadcast %48 : vector<1x1xf32> to vector<1x8xf32>
    %50 = arith.addf %47, %49 : vector<1x8xf32>
    %c0_12 = arith.constant 0 : index
    %c0_13 = arith.constant 0 : index
    %51 = vector.load %arg5[%c0_12, %c0_13] : memref<2x8xf32, #tpu.memory_space<vmem>>, vector<1x8xf32>
    tpu.vector_store %arg5[%c0_12, %c0_13], %50 {strides = array<i32>} : memref<2x8xf32, #tpu.memory_space<vmem>>, vector<1x8xf32>,
    %52 = vector.extract_strided_slice %3 {offsets = [0, 1], sizes = [20, 1], strides = [1, 1]} : vector<20x2xf32> to vector<20x1xf32>
    %53 = vector.broadcast %52 : vector<20x1xf32> to vector<20x8xf32>
    %54 = arith.mulf %42, %53 : vector<20x8xf32>
    %cst_14 = arith.constant dense<0.000000e+00> : vector<8xf32>
    %55 = vector.multi_reduction <add>, %54, %cst_14 [0] : vector<20x8xf32> to vector<8xf32>
    %56 = vector.shape_cast %55 : vector<8xf32> to vector<1x8xf32>
    %57 = vector.extract_strided_slice %4 {offsets = [1, 0], sizes = [1, 1], strides = [1, 1]} : vector<2x1xf32> to vector<1x1xf32>
    %58 = vector.broadcast %57 : vector<1x1xf32> to vector<1x8xf32>
    %59 = arith.addf %56, %58 : vector<1x8xf32>
    %c1 = arith.constant 1 : index
    %c0_15 = arith.constant 0 : index
    %60 = vector.load %arg5[%c1, %c0_15] : memref<2x8xf32, #tpu.memory_space<vmem>>, vector<1x8xf32>
    tpu.vector_store %arg5[%c1, %c0_15], %59 {strides = array<i32>} : memref<2x8xf32, #tpu.memory_space<vmem>>, vector<1x8xf32>,
    return
  }
}

</mosaic_0001>

<bundles_post_ra>
// kernel: tpu_custom_call.1
= control target key start
LH: loop header
LB: loop body
LE: loop exit
PB: predicated region body
PF: predicated region fallthrough
CT: control target
= control target key end

     0   :  { %v308_v2 = vmov 0   ;;  %s380_s0 = inlined_call_operand.vmem [shape: f32[5,8], index: 0, kind: input, shape index: {}]   ;;  %s381_s1 = inlined_call_operand.vmem [shape: f32[20,5], index: 1, kind: input, shape index: {}]   ;;  %s382_s2 = inlined_call_operand.vmem [shape: f32[20,1], index: 2, kind: input, shape index: {}]   ;;  %s383_s3 = inlined_call_operand.vmem [shape: f32[20,2], index: 3, kind: input, shape index: {}]   ;;  %s384_s4 = inlined_call_operand.vmem [shape: f32[2,1], index: 4, kind: input, shape index: {}]   ;;  %s385_s5 = inlined_call_operand.hbm [shape: f32[2,8], index: 5, kind: output, shape index: {}]  }
   0x1   :  { %v24_v0 = vld [vmem:[%s381_s1 + $0x10] sm:$0xf]  ;;  %v22_v1 = vld [vmem:[%s381_s1] sm:$0xff]  ;;  %261 = vset.pattern.permute.xlu1 %v308_v2  ;;  %260 = vset.pattern.permute.xlu0 %v308_v2  ;;  %v23_v4 = vld [vmem:[%s381_s1 + $0x8] sm:$0xff] }
   0x2   :  { %44 = vperm.xlu1 %261, %v24_v0   ;;  %34 = vperm.xlu0 %260, %v22_v1   ;;  %v25_v3 = vld [vmem:[%s382_s2] sm:$0xff] }
   0x3   :  { %10 = vsyncpa [#allocation3], 0  ;;  %v26_v5 = vld [vmem:[%s382_s2 + $0x8] sm:$0xff]  ;;  %v309_v6 = vmov 1   ;;  %v27_v7 = vld [vmem:[%s382_s2 + $0x10] sm:$0xf]  ;;  %v47_v19 = vlaneseq }
   0x4   :  { %v310_v8 = vmov 2   ;;  %v311_v9 = vmov 3   ;;  %v312_v10 = vmov 4   ;;  %v28_v11 = vld [vmem:[%s383_s3] sm:$0xff]  ;;  %v29_v12 = vld [vmem:[%s383_s3 + $0x8] sm:$0xff]  ;;  %vm190_vm0 = vcmask 64512  }
   0x5   :  { %v31_v13 = vld [vmem:[%s384_s4] sm:$0x3]  ;;  %v30_v14 = vld [vmem:[%s383_s3 + $0x10] sm:$0xf]  ;;  %v48_v22 = vshrl.u32 %v47_v19, 7  ;;  %vm194_vm1 = vcmask 60416  }
   0x6   :  { %56 = vperm.xlu1 %261, %v25_v3   ;;  %39 = vperm.xlu0 %260, %v23_v4   ;;  %v21_v27 = vld [vmem:[%s380_s0] sm:$0x1f]  ;;  %s313_s0 = smov [#allocation2]   ;;  %vm209_vm2 = vcmask 57344   ;;  %vm238_vm3 = vcmask 58369  }
   0x7   :  { %v49_v25 = vsub.s32 0, %v48_v22  ;;  %v86_v26 = vsub.s32 1, %v48_v22  ;;  %v108_v28 = vsub.s32 2, %v48_v22  ;;  %v130_v33 = vsub.s32 3, %v48_v22  ;;  %s246_s3 = sshll.u32 %s313_s0, 4  ;;  %s247_s3 = int_to_ptr.vmem [resolvable:$true] %s246_s3 }
   0x8   :  { %v152_v36 = vsub.s32 4, %v48_v22  ;;  %s286_s12 = scalar_lea.vmem %s247_s3, 32  ;;  %p291_p1 = scmp.lt.s32.totalorder %s247_s3, %s247_s3 }
   0x9   :  { %v50_v31 = vrot.slane %v21_v27, %v49_v25  ;;  %v87_v32 = vrot.slane %v21_v27, %v86_v26  ;;  %v109_v35 = vrot.slane %v21_v27, %v108_v28  ;;  %v131_v39 = vrot.slane %v21_v27, %v130_v33  ;;  %p287_p0 = scmp.ne.s32.totalorder %s247_s3, %s286_s12  ;;  %p292_p2 = scmp.lt.s32.totalorder %s286_s12, %s286_s12 }
   0xa   :  { %262 = vset.pattern.permute.xlu1 %v309_v6  ;;  %61 = vperm.xlu0 %260, %v26_v5   ;;  %v153_v43 = vrot.slane %v21_v27, %v152_v36 }
   0xb   :  { %73 = vperm.xlu1 %262, %v22_v1   ;;  %p293_p3 = por %p292_p2, %p291_p1 }
   0xd   :  { %p294_p4 = pnand %p293_p3, %p287_p0 }
   0xe   :  { %263 = vset.pattern.permute.xlu0 %v309_v6 }
   0xf   :  { %264 = vset.pattern.permute.xlu1 %v308_v2  ;;  %77 = vperm.xlu0 %263, %v23_v4  }
  0x10   :  { %66 = vperm.xlu1 %264, %v27_v7  }
  0x13   :  { %266 = vset.pattern.permute.xlu0 %v310_v8 }
  0x14   :  { %265 = vset.pattern.permute.xlu1 %v309_v6  ;;  %95 = vperm.xlu0 %266, %v22_v1  }
  0x15   :  { %81 = vperm.xlu1 %265, %v24_v0  }
  0x18   :  { %268 = vset.pattern.permute.xlu0 %v311_v9 }
  0x19   :  { %267 = vset.pattern.permute.xlu1 %v310_v8  ;;  %117 = vperm.xlu0 %268, %v22_v1  }
  0x1a   :  { %99 = vperm.xlu1 %267, %v23_v4  }
  0x1d   :  { %270 = vset.pattern.permute.xlu0 %v312_v10 }
  0x1e   :  { %103 = vperm.xlu1 %267, %v24_v0   ;;  %139 = vperm.xlu0 %270, %v22_v1  }
  0x22   :  { %269 = vset.pattern.permute.xlu1 %v311_v9  ;;  %272 = vset.pattern.permute.xlu0 %v308_v2 }
  0x23   :  { %121 = vperm.xlu1 %269, %v23_v4   ;;  %174 = vperm.xlu0 %272, %v28_v11  }
  0x27   :  { %125 = vperm.xlu1 %269, %v24_v0   ;;  %275 = vset.pattern.permute.xlu0 %v309_v6 }
  0x28   :  { %216 = vperm.xlu0 %275, %v29_v12  }
  0x2b   :  { %271 = vset.pattern.permute.xlu1 %v312_v10 }
  0x2c   :  { %143 = vperm.xlu1 %271, %v23_v4   ;;  %278 = vset.pattern.permute.xlu0 %v308_v2 }
  0x2d   :  { %205 = vperm.xlu0 %278, %v31_v13  }
  0x30   :  { %147 = vperm.xlu1 %271, %v24_v0  }
  0x31   :  { %279 = vset.pattern.permute.xlu0 %v309_v6 }
  0x34   :  { %273 = vset.pattern.permute.xlu1 %v308_v2 }
  0x35   :  { %179 = vperm.xlu1 %273, %v29_v12  }
  0x39   :  { %274 = vset.pattern.permute.xlu1 %v309_v6 }
  0x3a   :  { %212 = vperm.xlu1 %274, %v28_v11  }
  0x3e   :  { %276 = vset.pattern.permute.xlu1 %v308_v2 }
  0x3f   :  { %184 = vperm.xlu1 %276, %v30_v14  }
  0x43   :  { %277 = vset.pattern.permute.xlu1 %v309_v6 }
  0x44   :  { %220 = vperm.xlu1 %277, %v30_v14  }
  0x7d   :  { %v45_v15 = vpop.permute.xlu1 %44  ;;  %v35_v16 = vpop.permute.xlu0 %34 }
  0x7e   :  { %v51_v34 = vmul.f32 %v50_v31, %v35_v16  ;;  %v53_v59 = vmul.f32 %v50_v31, %v45_v15 }
  0x81   :  { %v57_v17 = vpop.permute.xlu1 %56  ;;  %v40_v18 = vpop.permute.xlu0 %39 }
  0x82   :  { %v69_v41 = vadd.f32 %v57_v17, %v51_v34  ;;  %v52_v50 = vmul.f32 %v50_v31, %v40_v18 }
  0x85   :  { %v62_v20 = vpop.permute.xlu0 %61 }
  0x86   :  { %v74_v21 = vpop.permute.xlu1 %73  ;;  %v70_v54 = vadd.f32 %v62_v20, %v52_v50 }
  0x87   :  { %v88_v38 = vmul.f32 %v87_v32, %v74_v21 }
  0x89   :  { %v91_v44 = vadd.f32 %v88_v38, %v69_v41 }
  0x8a   :  { %v78_v23 = vpop.permute.xlu0 %77 }
  0x8b   :  { %v67_v24 = vpop.permute.xlu1 %66  ;;  %v89_v55 = vmul.f32 %v87_v32, %v78_v23 }
  0x8c   :  { %v71_v63 = vadd.f32 %v67_v24, %v53_v59 }
  0x8d   :  { %v92_v60 = vadd.f32 %v89_v55, %v70_v54 }
  0x8f   :  { %v96_v29 = vpop.permute.xlu0 %95 }
  0x90   :  { %v82_v30 = vpop.permute.xlu1 %81  ;;  %v110_v42 = vmul.f32 %v109_v35, %v96_v29 }
  0x91   :  { %v90_v61 = vmul.f32 %v87_v32, %v82_v30 }
  0x92   :  { %v113_v48 = vadd.f32 %v110_v42, %v91_v44 }
  0x93   :  { %v93_v3 = vadd.f32 %v90_v61, %v71_v63 }
  0x94   :  { %v118_v37 = vpop.permute.xlu0 %117 }
  0x95   :  { %v100_v40 = vpop.permute.xlu1 %99  ;;  %v132_v45 = vmul.f32 %v131_v39, %v118_v37 }
  0x96   :  { %v111_v56 = vmul.f32 %v109_v35, %v100_v40 }
  0x97   :  { %v135_v51 = vadd.f32 %v132_v45, %v113_v48 }
  0x98   :  { %v114_v0 = vadd.f32 %v111_v56, %v92_v60 }
  0x99   :  { %v104_v46 = vpop.permute.xlu1 %103  ;;  %v140_v47 = vpop.permute.xlu0 %139 }
  0x9a   :  { %v154_v49 = vmul.f32 %v153_v43, %v140_v47  ;;  %v112_v1 = vmul.f32 %v109_v35, %v104_v46 }
  0x9c   :  { %v157_v53 = vadd.f32 %v154_v49, %v135_v51  ;;  %v115_v7 = vadd.f32 %v112_v1, %v93_v3 }
  0x9e   :  { %v122_v52 = vpop.permute.xlu1 %121  ;;  %v160_v58 = vmul.f32 0.5, %v157_v53  ;;  %v175_v19 = vpop.permute.xlu0 %174 }
  0x9f   :  { %v133_v62 = vmul.f32 %v131_v39, %v122_v52 }
  0xa0   :  { %280 = vtanh.f32 %v160_v58 }
  0xa1   :  { %v136_v4 = vadd.f32 %v133_v62, %v114_v0 }
  0xa2   :  { %v126_v57 = vpop.permute.xlu1 %125 }
  0xa3   :  { %v134_v5 = vmul.f32 %v131_v39, %v126_v57  ;;  %v217_v24 = vpop.permute.xlu0 %216 }
  0xa5   :  { %v137_v10 = vadd.f32 %v134_v5, %v115_v7 }
  0xa7   :  { %v144_v2 = vpop.permute.xlu1 %143 }
  0xa8   :  { %v155_v6 = vmul.f32 %v153_v43, %v144_v2  ;;  %v206_v56 = vpop.permute.xlu0 %205 }
  0xaa   :  { %v158_v8 = vadd.f32 %v155_v6, %v136_v4 }
  0xab   :  { %v148_v9 = vpop.permute.xlu1 %147 }
  0xac   :  { %v161_v11 = vmul.f32 0.5, %v158_v8  ;;  %v156_v12 = vmul.f32 %v153_v43, %v148_v9 }
  0xad   :  { %v281_v16 = vpop.eup %280 }
  0xae   :  { %282 = vtanh.f32 %v161_v11  ;;  %v159_v13 = vadd.f32 %v156_v12, %v137_v10  ;;  %v166_v17 = vmul.f32 0.5, %v281_v16 }
  0xb0   :  { %v162_v14 = vmul.f32 0.5, %v159_v13  ;;  %v180_v15 = vpop.permute.xlu1 %179  ;;  %v169_v21 = vadd.f32 0.5, %v166_v17 }
  0xb2   :  { %284 = vtanh.f32 %v162_v14  ;;  %v187_v27 = vmul.f32 %v175_v19, %v169_v21 }
  0xb4   :  { %v191_v36 = vsel %vm190_vm0, %v187_v27, 0.0 }
  0xb5   :  { %v213_v18 = vpop.permute.xlu1 %212 }
  0xb6   :  { %v223_v29 = vmul.f32 %v213_v18, %v169_v21 }
  0xb8   :  { %v226_v37 = vsel %vm190_vm0, %v223_v29, 0.0 }
  0xba   :  { %v185_v22 = vpop.permute.xlu1 %184 }
  0xbb   :  { %v283_v20 = vpop.eup %282 }
  0xbc   :  { %v167_v23 = vmul.f32 0.5, %v283_v20 }
  0xbe   :  { %v170_v25 = vadd.f32 0.5, %v167_v23 }
  0xbf   :  { %v285_v26 = vpop.eup %284  ;;  %v221_v32 = vpop.permute.xlu1 %220 }
  0xc0   :  { %v188_v28 = vmul.f32 %v180_v15, %v170_v25  ;;  %v168_v30 = vmul.f32 0.5, %v285_v26  ;;  %v224_v31 = vmul.f32 %v217_v24, %v170_v25 }
  0xc2   :  { %v192_v33 = vsel %vm190_vm0, %v188_v28, 0.0  ;;  %v171_v34 = vadd.f32 0.5, %v168_v30  ;;  %v227_v35 = vsel %vm190_vm0, %v224_v31, 0.0 }
  0xc3   :  { %v193_v40 = vadd.f32 %v192_v33, %v191_v36  ;;  %v228_v41 = vadd.f32 %v227_v35, %v226_v37 }
  0xc4   :  { %v189_v38 = vmul.f32 %v185_v22, %v171_v34  ;;  %v225_v39 = vmul.f32 %v221_v32, %v171_v34 }
  0xc6   :  { %v195_v42 = vsel %vm194_vm1, %v189_v38, 0.0  ;;  %v229_v43 = vsel %vm194_vm1, %v225_v39, 0.0 }
  0xc7   :  { %v196_v44 = vadd.f32 %v195_v42, %v193_v40  ;;  %v230_v45 = vadd.f32 %v229_v43, %v228_v41 }
  0xc9   :  { %v197_v46 = vrot.slane %v196_v44, 4  ;;  %v231_v47 = vrot.slane %v230_v45, 4 }
  0xcb   :  { %v198_v48 = vadd.f32 %v197_v46, %v196_v44  ;;  %v232_v49 = vadd.f32 %v231_v47, %v230_v45 }
  0xcd   :  { %v199_v50 = vrot.slane %v198_v48, 2  ;;  %v233_v51 = vrot.slane %v232_v49, 2 }
  0xcf   :  { %v200_v52 = vadd.f32 %v199_v50, %v198_v48  ;;  %v234_v53 = vadd.f32 %v233_v51, %v232_v49 }
  0xd1   :  { %v201_v54 = vrot.slane %v200_v52, 1  ;;  %v235_v55 = vrot.slane %v234_v53, 1 }
  0xd3   :  { %v202_v57 = vadd.f32 %v201_v54, %v200_v52  ;;  %v236_v58 = vadd.f32 %v235_v55, %v234_v53 }
  0xd5   :  { %v208_v59 = vadd.f32 %v206_v56, %v202_v57  ;;  %v237_v60 = vadd.f32 %v236_v58, %v206_v56 }
  0xd7   :  { %210 = vst.msk [vmem:[#allocation2] sm:$0x1] %vm209_vm2, %v208_v59 }
  0xd8   :  { %239 = vst.msk [vmem:[#allocation2] sm:$0x2] %vm238_vm3, %v237_v60 }
  0xd9   :  { %297 = shalt.err (!%p294_p4)
}
  0xda   :  { %249 = dma.vmem_to_hbm [thread:$0]  %s247_s3, 32, %s385_s5, [#allocation3]  }
  0xdb   :  { %306 = dma.done.wait [#allocation3], 32  }
  0xdc   :  { %307 = vsyncadd [#allocation3], 4294967264 }
  0xdd   :  { %253 = vsyncpa [#allocation3], 1 }

</bundles_post_ra>
